<compile_context>
chip_gen: v7x
topology: tpu7x:2x2x1
jax: 0.10.0
libtpu: 0.0.40
codegen_flags: <defaults>
</compile_context>

<pallas_src>
import functools

import jax
import jax.numpy as jnp
from jax.experimental import pallas as pl
from jax.experimental.pallas import tpu as pltpu

_MIB = 1024 * 1024


def _vmem_capacity_bytes():
    """Physical VMEM per TensorCore; conservative 64 MiB fallback."""
    try:
        return int(pltpu.get_tpu_info().vmem_capacity_bytes)
    except Exception:
        return 64 * _MIB


def _resident_spec(shape, index_map):
    """BlockSpec for a grid-constant block: single-buffered when supported
    (a constant block index never needs a second prefetch buffer)."""
    try:
        return pl.BlockSpec(shape, index_map, pipeline_mode=pl.Buffered(1))
    except Exception:
        return pl.BlockSpec(shape, index_map)


def _largest_hidden_tile(H, cap):
    """Largest multiple-of-128 divisor of H that is <= cap (None if none)."""
    best = None
    t = 128
    limit = min(H, cap)
    while t <= limit:
        if H % t == 0:
            best = t
        t += 128
    return best


def _round8(v):
    return max(8, ((int(v) + 7) // 8) * 8)


def _ffn_kernel(x_ref, w1_ref, b1_ref, w2_ref, b2_ref, o_ref, acc_ref, xb_ref):
    h_idx = pl.program_id(1)

    @pl.when(h_idx == 0)
    def _():
        # Cast the x row tile to bf16 once per row tile (not once per hidden
        # step) and fold the final bias into the accumulator init.
        xb_ref[...] = x_ref[...].astype(jnp.bfloat16)
        acc_ref[...] = jnp.broadcast_to(b2_ref[...], acc_ref.shape)

    # matmul 1: (tm, C) @ (C, th) on the MXU in bf16, f32 accumulate.
    h = jnp.dot(xb_ref[...], w1_ref[...], preferred_element_type=jnp.float32)
    h = jnp.maximum(h + b1_ref[...], 0.0)                 # bias + ReLU in f32

    # matmul 2 partial: (tm, th) @ (th, C) accumulated into the (tm, C) f32 acc.
    acc_ref[...] += jnp.dot(h.astype(jnp.bfloat16), w2_ref[...],
                            preferred_element_type=jnp.float32)

    @pl.when(h_idx == pl.num_programs(1) - 1)
    def _():
        # TODO(synk): training-mode dropout would need pltpu.prng_seed /
        # pltpu.prng_random_bits masking here; eval mode => identity.
        o_ref[...] = acc_ref[...].astype(o_ref.dtype)


def prepare_params(w1, b1, w2, b2):
    """One-time cast of the weights to bf16 (MXU peak dtype) and biases to 2-D
    f32 rows, so each forward call does not pay an extra HBM pass re-casting
    the weight matrices."""
    return (jnp.asarray(w1, jnp.bfloat16),
            jnp.asarray(b1, jnp.float32).reshape(1, -1),
            jnp.asarray(w2, jnp.bfloat16),
            jnp.asarray(b2, jnp.float32).reshape(1, -1))


@functools.partial(jax.jit, static_argnames=("block_m", "block_h"))
def feed_forward(x, w1, b1, w2, b2, *, block_m=None, block_h=None):
    """x: (B, T, C). w1: (C, 4C), b1: (4C,), w2: (4C, C), b2: (C,).

    Weights may be pre-cast to bf16 with prepare_params(); the astype below is
    then a no-op under jit.
    """
    B, T, C = x.shape
    H = w1.shape[1]                                     # 4 * C
    M = B * T
    x2 = x.reshape(M, C)

    # No-ops if prepare_params() already cast / reshaped these.
    w1_bf = w1.astype(jnp.bfloat16)
    w2_bf = w2.astype(jnp.bfloat16)
    b1_2d = b1.reshape(1, H).astype(jnp.float32)
    b2_2d = b2.reshape(1, C).astype(jnp.float32)

    # ---- generation-aware VMEM budget ---------------------------------------
    cap = _vmem_capacity_bytes()            # ~64 MiB (v7x) / ~128 MiB (v5e/v6e)
    budget = max(16 * _MIB, min(cap * 3 // 4, cap - 12 * _MIB))

    def plan_bytes(tm_, th_, resident_):
        b = 0
        if resident_:
            b += 2 * C * H * 2               # W1 + W2 bf16, single-buffered
        else:
            b += 2 * (2 * C * th_) * 2       # W1 + W2 slices bf16, double-buffered
        b += 2 * tm_ * C * 4                 # x tiles (f32, double-buffered)
        b += 2 * tm_ * C * 4                 # out tiles (f32, double-buffered)
        b += tm_ * C * 4                     # f32 accumulator scratch
        b += tm_ * C * 2                     # bf16 x scratch
        b += tm_ * th_ * (4 + 2)             # hidden intermediate f32 + bf16 copy
        b += 4 * (H + C) * 4                 # biases (generous)
        return b

    # ---- row tile -----------------------------------------------------------
    tm = min(block_m if block_m is not None else 512, _round8(M))
    tm = _round8((tm // 8) * 8)

    # ---- weight-resident fast path ------------------------------------------
    resident = plan_bytes(tm, H, True) <= budget
    if not resident:
        for cand in (256, 128):
            if cand < tm and plan_bytes(cand, H, True) <= budget:
                tm, resident = cand, True
                break

    if resident:
        th = H
    else:
        th_cap = block_h if block_h is not None else (256 if cap <= 80 * _MIB else 512)
        th = _largest_hidden_tile(H, th_cap) or H
        # Shrink th first (keeps FLOP/byte on the binding weight stream high),
        # then tm, until the plan fits the budget.
        while plan_bytes(tm, th, False) > budget and th > 128:
            nxt = _largest_hidden_tile(H, th - 128)
            if nxt is None:
                break
            th = nxt
        while plan_bytes(tm, th, False) > budget and tm > 128:
            tm = _round8(tm // 2)
    n_h = H // th

    # Keep >= 2 row tiles so v7x's two TensorCores both get work (the hidden
    # axis is a reduction and cannot absorb the second core).  Only split when
    # it cannot hurt the weight-stream intensity of the hidden-tiled path.
    if M > 8 and (M + tm - 1) // tm < 2 and (resident or tm >= 512):
        tm = min(_round8((M + 1) // 2), _round8(M))

    M_pad = ((M + tm - 1) // tm) * tm
    if M_pad != M:
        x2 = jnp.pad(x2, ((0, M_pad - M), (0, 0)))
    n_m = M_pad // tm

    # ---- VMEM limit ----------------------------------------------------------
    est = plan_bytes(tm, th, resident)
    vmem_limit = int(min(budget, max(32 * _MIB, est * 5 // 4)))
    vmem_limit = int(max(vmem_limit, min(est + 2 * _MIB, cap - 8 * _MIB)))

    # ---- BlockSpecs -----------------------------------------------------------
    if resident:
        w1_spec = _resident_spec((C, th), lambda i, h: (0, 0))
        b1_spec = _resident_spec((1, th), lambda i, h: (0, 0))
        w2_spec = _resident_spec((th, C), lambda i, h: (0, 0))
        b2_spec = _resident_spec((1, C), lambda i, h: (0, 0))
    else:
        w1_spec = pl.BlockSpec((C, th), lambda i, h: (0, h))
        b1_spec = pl.BlockSpec((1, th), lambda i, h: (0, h))
        w2_spec = pl.BlockSpec((th, C), lambda i, h: (h, 0))
        b2_spec = pl.BlockSpec((1, C), lambda i, h: (0, 0))

    # Honest HBM traffic: weights are streamed once when resident, otherwise
    # re-fetched for every row tile (hidden axis is innermost).
    weight_stream = (1 if resident else n_m) * (2 * C * H) * 2
    cost = pl.CostEstimate(
        flops=int(4 * M_pad * C * H),
        transcendentals=0,
        bytes_accessed=int(2 * M_pad * C * 4                 # x read + out write
                           + weight_stream
                           + (1 if resident else n_m) * (H + C) * 4))

    out = pl.pallas_call(
        _ffn_kernel,
        out_shape=jax.ShapeDtypeStruct((M_pad, C), x.dtype),
        grid_spec=pltpu.PrefetchScalarGridSpec(
            num_scalar_prefetch=0,
            grid=(n_m, n_h),
            in_specs=[
                pl.BlockSpec((tm, C), lambda i, h: (i, 0)),   # x rows
                w1_spec,                                      # W1 (slice)
                b1_spec,                                      # b1 (slice)
                w2_spec,                                      # W2 (slice)
                b2_spec,                                      # b2
            ],
            out_specs=pl.BlockSpec((tm, C), lambda i, h: (i, 0)),
            scratch_shapes=[pltpu.VMEM((tm, C), jnp.float32),    # f32 accumulator
                            pltpu.VMEM((tm, C), jnp.bfloat16)],  # bf16 x tile
        ),
        compiler_params=pltpu.CompilerParams(
            dimension_semantics=("parallel", "arbitrary"),
            vmem_limit_bytes=int(vmem_limit)),
        cost_estimate=cost,
    )(x2, w1_bf, b1_2d, w2_bf, b2_2d)

    if M_pad != M:
        out = out[:M]
    return out.reshape(B, T, C)


def init_params(key, n_embeddings):
    """Deterministic init matching nn.Linear shapes (stored transposed:
    w1 is (C, 4C), w2 is (4C, C) so the kernel does x @ W)."""
    C = n_embeddings
    H = 4 * C
    k1, k2, k3, k4 = jax.random.split(key, 4)
    lim1 = 1.0 / jnp.sqrt(C)
    lim2 = 1.0 / jnp.sqrt(H)
    w1 = jax.random.uniform(k1, (C, H), jnp.float32, -lim1, lim1)
    b1 = jax.random.uniform(k2, (H,), jnp.float32, -lim1, lim1)
    w2 = jax.random.uniform(k3, (H, C), jnp.float32, -lim2, lim2)
    b2 = jax.random.uniform(k4, (C,), jnp.float32, -lim2, lim2)
    return w1, b1, w2, b2


if __name__ == "__main__":
    key = jax.random.PRNGKey(0)
    B, T, C = 2, 8, 32                       # batch=2, seq=8, n_embeddings=32
    kx, kp = jax.random.split(key)
    x = jax.random.normal(kx, (B, T, C), jnp.float32)
    w1, b1, w2, b2 = init_params(kp, C)

    # Hoist the bf16 weight casts out of the per-call hot path.
    w1_bf, b1_p, w2_bf, b2_p = prepare_params(w1, b1, w2, b2)

    y = feed_forward(x, w1_bf, b1_p, w2_bf, b2_p)
    jax.block_until_ready(y)

    # Reference in plain JAX f32; kernel matmuls feed the MXU in bf16, so the
    # tolerance is loosened accordingly.
    ref = (jnp.maximum(x.reshape(-1, C) @ w1 + b1, 0.0) @ w2 + b2).reshape(B, T, C)
    assert y.shape == (B, T, C)
    assert jnp.allclose(y, ref, atol=5e-2, rtol=5e-2), float(
        jnp.max(jnp.abs(y - ref)))

    print("KERNEL_OK")
</pallas_src>

<mosaic_0001>
module attributes {stable_mosaic.version = 11 : i64} {
  func.func @_ffn_kernel(%arg0: i32, %arg1: i32, %arg2: memref<8x32xf32, #tpu.memory_space<vmem>>, %arg3: memref<32x128xbf16, #tpu.memory_space<vmem>>, %arg4: memref<1x128xf32, #tpu.memory_space<vmem>>, %arg5: memref<128x32xbf16, #tpu.memory_space<vmem>>, %arg6: memref<1x32xf32, #tpu.memory_space<vmem>>, %arg7: memref<8x32xf32, #tpu.memory_space<vmem>>, %arg8: memref<8x32xf32, #tpu.memory_space<vmem>>, %arg9: memref<8x32xbf16, #tpu.memory_space<vmem>>) attributes {dimension_semantics = [#tpu.dimension_semantics<parallel>, #tpu.dimension_semantics<arbitrary>], iteration_bounds = array<i64: 2, 1>, scalar_prefetch = 0 : i64, scratch_operands = 2 : i64, tpu.core_type = #tpu.core_type<tc>, window_params = [{transform_indices = @transform_0, window_bounds = array<i64: 8, 32>}, {pipeline_mode = #tpu.pipeline_mode<synchronous>, transform_indices = @transform_1, window_bounds = array<i64: 32, 128>}, {pipeline_mode = #tpu.pipeline_mode<synchronous>, transform_indices = @transform_2, window_bounds = array<i64: 1, 128>}, {pipeline_mode = #tpu.pipeline_mode<synchronous>, transform_indices = @transform_3, window_bounds = array<i64: 128, 32>}, {pipeline_mode = #tpu.pipeline_mode<synchronous>, transform_indices = @transform_4, window_bounds = array<i64: 1, 32>}, {transform_indices = @transform_5, window_bounds = array<i64: 8, 32>}]} {
    %c0_i32 = arith.constant 0 : i32
    %0 = arith.cmpi eq, %arg1, %c0_i32 : i32
    %1 = arith.extui %0 : i1 to i32
    %c0_i32_0 = arith.constant 0 : i32
    %2 = arith.cmpi ne, %1, %c0_i32_0 : i32
    scf.if %2 {
      %c0_16 = arith.constant 0 : index
      %c0_17 = arith.constant 0 : index
      %20 = vector.load %arg2[%c0_16, %c0_17] : memref<8x32xf32, #tpu.memory_space<vmem>>, vector<8x32xf32>
      %21 = arith.truncf %20 : vector<8x32xf32> to vector<8x32xbf16>
      %c0_18 = arith.constant 0 : index
      %c0_19 = arith.constant 0 : index
      %22 = vector.load %arg9[%c0_18, %c0_19] : memref<8x32xbf16, #tpu.memory_space<vmem>>, vector<8x32xbf16>
      tpu.vector_store %arg9[%c0_18, %c0_19], %21 {strides = array<i32>} : memref<8x32xbf16, #tpu.memory_space<vmem>>, vector<8x32xbf16>,
      %c0_20 = arith.constant 0 : index
      %c0_21 = arith.constant 0 : index
      %23 = vector.load %arg6[%c0_20, %c0_21] : memref<1x32xf32, #tpu.memory_space<vmem>>, vector<1x32xf32>
      %24 = vector.shape_cast %23 : vector<1x32xf32> to vector<1x32xf32>
      %25 = vector.broadcast %24 : vector<1x32xf32> to vector<8x32xf32>
      %c0_22 = arith.constant 0 : index
      %c0_23 = arith.constant 0 : index
      %26 = vector.load %arg8[%c0_22, %c0_23] : memref<8x32xf32, #tpu.memory_space<vmem>>, vector<8x32xf32>
      tpu.vector_store %arg8[%c0_22, %c0_23], %25 {strides = array<i32>} : memref<8x32xf32, #tpu.memory_space<vmem>>, vector<8x32xf32>,
    } else {
    }
    %c0 = arith.constant 0 : index
    %c0_1 = arith.constant 0 : index
    %3 = vector.load %arg9[%c0, %c0_1] : memref<8x32xbf16, #tpu.memory_space<vmem>>, vector<8x32xbf16>
    %c0_2 = arith.constant 0 : index
    %c0_3 = arith.constant 0 : index
    %4 = vector.load %arg3[%c0_2, %c0_3] : memref<32x128xbf16, #tpu.memory_space<vmem>>, vector<32x128xbf16>
    %cst = arith.constant dense<0.000000e+00> : vector<8x128xf32>
    %5 = tpu.matmul %3, %4, %cst {dimension_numbers = #tpu.dot_dimension_numbers<[1], [0], [0], [1], [0, 0, 1, 1], [], []>} : vector<8x32xbf16>, vector<32x128xbf16>, vector<8x128xf32> -> vector<8x128xf32>
    %c0_4 = arith.constant 0 : index
    %c0_5 = arith.constant 0 : index
    %6 = vector.load %arg4[%c0_4, %c0_5] : memref<1x128xf32, #tpu.memory_space<vmem>>, vector<1x128xf32>
    %7 = vector.broadcast %6 : vector<1x128xf32> to vector<8x128xf32>
    %8 = arith.addf %5, %7 : vector<8x128xf32>
    %cst_6 = arith.constant 0.000000e+00 : f32
    %9 = vector.broadcast %cst_6 : f32 to vector<8x128xf32>
    %10 = arith.maximumf %8, %9 : vector<8x128xf32>
    %c0_7 = arith.constant 0 : index
    %c0_8 = arith.constant 0 : index
    %11 = vector.load %arg8[%c0_7, %c0_8] : memref<8x32xf32, #tpu.memory_space<vmem>>, vector<8x32xf32>
    %12 = arith.truncf %10 : vector<8x128xf32> to vector<8x128xbf16>
    %c0_9 = arith.constant 0 : index
    %c0_10 = arith.constant 0 : index
    %13 = vector.load %arg5[%c0_9, %c0_10] : memref<128x32xbf16, #tpu.memory_space<vmem>>, vector<128x32xbf16>
    %cst_11 = arith.constant dense<0.000000e+00> : vector<8x32xf32>
    %14 = tpu.matmul %12, %13, %cst_11 {dimension_numbers = #tpu.dot_dimension_numbers<[1], [0], [0], [1], [0, 0, 1, 1], [], []>} : vector<8x128xbf16>, vector<128x32xbf16>, vector<8x32xf32> -> vector<8x32xf32>
    %15 = arith.addf %11, %14 : vector<8x32xf32>
    %c0_12 = arith.constant 0 : index
    %c0_13 = arith.constant 0 : index
    %16 = vector.load %arg8[%c0_12, %c0_13] : memref<8x32xf32, #tpu.memory_space<vmem>>, vector<8x32xf32>
    tpu.vector_store %arg8[%c0_12, %c0_13], %15 {strides = array<i32>} : memref<8x32xf32, #tpu.memory_space<vmem>>, vector<8x32xf32>,
    %c0_i32_14 = arith.constant 0 : i32
    %17 = arith.cmpi eq, %arg1, %c0_i32_14 : i32
    %18 = arith.extui %17 : i1 to i32
    %c0_i32_15 = arith.constant 0 : i32
    %19 = arith.cmpi ne, %18, %c0_i32_15 : i32
    scf.if %19 {
      %c0_16 = arith.constant 0 : index
      %c0_17 = arith.constant 0 : index
      %20 = vector.load %arg8[%c0_16, %c0_17] : memref<8x32xf32, #tpu.memory_space<vmem>>, vector<8x32xf32>
      %c0_18 = arith.constant 0 : index
      %c0_19 = arith.constant 0 : index
      %21 = vector.load %arg7[%c0_18, %c0_19] : memref<8x32xf32, #tpu.memory_space<vmem>>, vector<8x32xf32>
      tpu.vector_store %arg7[%c0_18, %c0_19], %20 {strides = array<i32>} : memref<8x32xf32, #tpu.memory_space<vmem>>, vector<8x32xf32>,
    } else {
    }
    return
  }
  func.func @transform_0(%arg0: i32, %arg1: i32) -> (i32, i32) {
    %c0_i32 = arith.constant 0 : i32
    %c0_i32_0 = arith.constant 0 : i32
    return %arg0, %c0_i32 : i32, i32
  }
  func.func @transform_1(%arg0: i32, %arg1: i32) -> (i32, i32) {
    %c0_i32 = arith.constant 0 : i32
    %c0_i32_0 = arith.constant 0 : i32
    %c0_i32_1 = arith.constant 0 : i32
    return %c0_i32, %c0_i32_0 : i32, i32
  }
  func.func @transform_2(%arg0: i32, %arg1: i32) -> (i32, i32) {
    %c0_i32 = arith.constant 0 : i32
    %c0_i32_0 = arith.constant 0 : i32
    %c0_i32_1 = arith.constant 0 : i32
    return %c0_i32, %c0_i32_0 : i32, i32
  }
  func.func @transform_3(%arg0: i32, %arg1: i32) -> (i32, i32) {
    %c0_i32 = arith.constant 0 : i32
    %c0_i32_0 = arith.constant 0 : i32
    %c0_i32_1 = arith.constant 0 : i32
    return %c0_i32, %c0_i32_0 : i32, i32
  }
  func.func @transform_4(%arg0: i32, %arg1: i32) -> (i32, i32) {
    %c0_i32 = arith.constant 0 : i32
    %c0_i32_0 = arith.constant 0 : i32
    %c0_i32_1 = arith.constant 0 : i32
    return %c0_i32, %c0_i32_0 : i32, i32
  }
  func.func @transform_5(%arg0: i32, %arg1: i32) -> (i32, i32) {
    %c0_i32 = arith.constant 0 : i32
    %c0_i32_0 = arith.constant 0 : i32
    return %arg0, %c0_i32 : i32, i32
  }
}

</mosaic_0001>

<bundles_post_ra>
// kernel: feed_forward.1
= control target key start
LH: loop header
LB: loop body
LE: loop exit
PB: predicated region body
PF: predicated region fallthrough
CT: control target
= control target key end

     0   :  { %10 = vsyncpa [#allocation5], 0  ;;  %s909_s0 = inlined_call_operand.vmem [shape: f32[16,32], index: 0, kind: input, shape index: {}]   ;;  %s910_s1 = inlined_call_operand.vmem [shape: bf16[32,128], index: 1, kind: input, shape index: {}]   ;;  %s911_s2 = inlined_call_operand.vmem [shape: f32[1,128], index: 2, kind: input, shape index: {}]   ;;  %s912_s3 = inlined_call_operand.vmem [shape: bf16[128,32], index: 3, kind: input, shape index: {}]   ;;  %s913_s4 = inlined_call_operand.vmem [shape: f32[1,32], index: 4, kind: input, shape index: {}]   ;;  %s914_s5 = inlined_call_operand.hbm [shape: f32[16,32], index: 5, kind: output, shape index: {}]  }
   0x1   :  { %12 = vsyncpa [#allocation5 + $0x1], 0  ;;  %s757_s18 = smov 0   ;;  %s759_s19 = smov 0  }
   0x2   :  { %s761_s20 = smov 0   ;;  %s763_s21 = smov 0  }
   0x3   :  { %s765_s22 = smov 0   ;;  %s767_s23 = smov 0  }
   0x4 LB: > { %s513_s24 = sadd.s32 4294967295, %s722_s23   ;;  %s514_s25 = sadd.s32 4294967294, %s722_s23   ;;  %s722_s23 = sphi %s767_s23, %s18_s23   ;;  %s718_s22 = sphi %s765_s22, %s921_s22   ;;  %s714_s21 = sphi %s763_s21, %s920_s21   ;;  %s710_s20 = sphi %s761_s20, %s919_s20   ;;  %s706_s19 = sphi %s759_s19, %s918_s19   ;;  %s702_s18 = sphi %s757_s18, %s917_s18  }
   0x5   : > { %s30_s26 = sadd.s32 1, %s718_s22  ;;  %s147_s27 = sadd.s32 1, %s710_s20 }
   0x6   : > { %p32_p0 = scmp.ge.s32.totalorder %s30_s26, 2  ;;  %p157_p1 = scmp.ne.s32.totalorder %s710_s20, %s706_s19 }
   0x7   : > { %p158_p2 = scmp.eq.s32.totalorder %s513_s24, 1  ;;  %p163_p3 = scmp.ne.s32.totalorder %s706_s19, %s702_s18 }
   0x8   : > { %s923_s26 = smov (%p32_p0, %s30_s26), 0  ;;  %p164_p5 = scmp.eq.s32.totalorder %s514_s25, 1 }
   0x9   : > { %p797_p4 = por %p158_p2, %p157_p1  ;;  %s144_s29 = ssub.s32 %s718_s22, %s923_s26 }
   0xa   : > { %p517_p6 = scmp.ge.s32.totalorder %s722_s23, 1  ;;  %p145_p7 = scmp.eq.s32.totalorder %s144_s29, 0 }
   0xb   : > { %p804_p8 = por %p164_p5, %p163_p3  ;;  %p201_p9 = scmp.lt.s32.totalorder %s722_s23, 3 }
   0xc   : > { %s810_s6 = scalar_select %p145_p7, %s710_s20, %s147_s27  }
   0xd   : > { %p202_p10 = pnand %p517_p6, %p201_p9 }
   0xe   : > { %v634_v0 = vld [vmem:[%s910_s1] sm:$0xff] (!%p202_p10)   ;;  %v724_v1 = vmov (!%p202_p10), 0.0   ;;  %v635_v2 = vld [vmem:[%s910_s1 + $0x8] sm:$0xff] (!%p202_p10)   ;;  %vm725_vm0 = vmmov (!%p202_p10), 0   ;;  %p228_p11 = scmp.lt.s32.totalorder (!%p202_p10), %s714_s21, 1  ;;  %vm248_vm1 = vcmask (!%p202_p10), 261120  }
   0xf   : > { %205 = sbr.rel (%p202_p10) target bundleno = 491 (0x1eb), region = 40  ;;  %549 = vmatprep.subr.bf16.mxu0 (!%p202_p10), %v724_v1  ;;  %557 = vmatprep.subr.bf16.mxu1 (!%p202_p10), %v724_v1  ;;  %v520_v3 = vld [vmem:[%s913_s4] ss:$0 sm:$0xff] (!%p202_p10)  ;;  %v637_v5 = vld [vmem:[%s912_s3 + $0x8] sm:$0xff] (!%p202_p10)   ;;  %vm239_vm2 = vcmask (!%p202_p10), 257024   ;;  %v638_v7 = vld [vmem:[%s912_s3 + $0x10] sm:$0xff] (!%p202_p10)  }
  0x10   : > { %550 = vmatpush3.bf16.msra.mxu0 (!%p202_p10), %v634_v0  ;;  %553 = vmatprep.mubr.msk.bf16.mxu0 (!%p202_p10), %vm725_vm0, %v724_v1  ;;  %v636_v4 = vld [vmem:[%s912_s3] sm:$0xff] (!%p202_p10)   ;;  %249 = vst.msk [vmem:[#allocation2] sm:$0xff] (!%p202_p10), %vm248_vm1, %v520_v3  ;;  %v639_v9 = vld [vmem:[%s912_s3 + $0x18] sm:$0xff] (!%p202_p10)   ;;  %v641_v12 = vld [vmem:[%s912_s3 + $0x28] sm:$0xff] (!%p202_p10)   ;;  %s534_s8 = sshll.u32 (!%p202_p10), %s714_s21, 7 }
  0x11   : > { %551 = vmatprep.subr.bf16.mxu0 (!%p202_p10), %v724_v1  ;;  %573 = vmatprep.mubr.msk.bf16.mxu1 (!%p202_p10), %vm725_vm0, %v724_v1  ;;  %v640_v10 = vld [vmem:[%s912_s3 + $0x20] sm:$0xff] (!%p202_p10)   ;;  %v642_v13 = vld [vmem:[%s912_s3 + $0x30] sm:$0xff] (!%p202_p10)   ;;  %v643_v14 = vld [vmem:[%s912_s3 + $0x38] sm:$0xff] (!%p202_p10)   ;;  %s861_s13 = scalar_lea.hbm (!%p202_p10), %s914_s5, %s534_s8 }
  0x12   : > { %558 = vmatpush3.bf16.msra.mxu1 (!%p202_p10), %v636_v4  ;;  %v521_v15 = vld [vmem:[%s911_s2] ss:$0 sm:$0xff] (!%p202_p10) }
  0x13   : > { %559 = vmatprep.subr.bf16.mxu1 (!%p202_p10), %v724_v1 }
  0x14   : > { %552 = vmatpush3.bf16.msra.mxu0 (!%p202_p10), %v635_v2 }
  0x16   : > { %s229_s15 = scalar_select %p228_p11, %s714_s21, 1  ;;  %560 = vmatpush3.bf16.msra.mxu1 %v637_v5 }
  0x17   : > { %561 = vmatprep.subr.bf16.mxu1 %v724_v1  ;;  %v319_v23 = vld [vmem:[#allocation2] sm:$0xff]  ;;  %s726_s21 = smov [#allocation4]  }
  0x18   : > { %s519_s24 = sshll.u32 %s229_s15, 3  ;;  %s648_s16 = sshll.u32 %s726_s21, 4  ;;  %s649_s16 = int_to_ptr.vmem [resolvable:$false] %s648_s16 }
  0x19   : > { %s231_s29 = scalar_lea.vmem %s909_s0, %s519_s24  ;;  %s650_s17 = scalar_lea.vmem %s649_s16, 256 }
  0x1a   : > { %v237_v6 = vld [vmem:[%s231_s29] sm:$0xff]  ;;  %562 = vmatpush3.bf16.msra.mxu1 %v638_v7  ;;  %s225_s29 = sand.u32 1, %s706_s19  }
  0x1b   : > { %v238_v8 = vpack.c.bf16 %v237_v6, %v237_v6  ;;  %563 = vmatprep.subr.bf16.mxu1 %v724_v1  ;;  %s518_s7 = sshll.u32 %s225_s29, 3  ;;  %s433_s14 = scalar_lea.sflag [#allocation5], %s225_s29 }
  0x1c   : > { %s227_s9 = scalar_lea.vmem [#allocation4], %s518_s7 }
  0x1d   : > { %240 = vst.msk [vmem:[#allocation3] sm:$0xf] %vm239_vm2, %v238_v8  ;;  %s446_s10 = sshll.u32 %s227_s9, 4  ;;  %s863_s10 = int_to_ptr.vmem [resolvable:$true] %s446_s10 }
  0x1e   : > { %564 = vmatpush3.bf16.msra.mxu1 %v639_v9  ;;  %s644_s15 = scalar_lea.vmem %s863_s10, 128  ;;  %p651_p1 = scmp.lt.s32.totalorder %s863_s10, %s649_s16 }
  0x1f   : > { %565 = vmatprep.subr.bf16.mxu1 %v724_v1  ;;  %p645_p12 = scmp.ne.s32.totalorder %s863_s10, %s644_s15  ;;  %p652_p2 = scmp.lt.s32.totalorder %s650_s17, %s644_s15 }
  0x21   : > { %p646_p13 = pnand %p645_p12, %p797_p4  ;;  %p653_p3 = por %p652_p2, %p651_p1 }
  0x22   : > { %566 = vmatpush3.bf16.msra.mxu1 %v640_v10 }
  0x23   : > { %567 = vmatprep.subr.bf16.mxu1 %v724_v1  ;;  %p647_p0 = pneg %p646_p13 }
  0x24   : > { %v250_v11 = vld [vmem:[#allocation3] sm:$0xf] }
  0x25   : > { %554 = vmatmul.mubr.msk.bf16.vlgmr.msra.gmra.mrb[0].mxu0 %vm248_vm1, %v250_v11  ;;  %p654_p5 = pnand %p653_p3, %p647_p0 }
  0x26   : > { %568 = vmatpush3.bf16.msra.mxu1 %v641_v12 }
  0x27   : > { %569 = vmatprep.subr.bf16.mxu1 %v724_v1 }
  0x2a   : > { %570 = vmatpush3.bf16.msra.mxu1 %v642_v13 }
  0x2b   : > { %571 = vmatprep.subr.bf16.mxu1 %v724_v1 }
  0x2e   : > { %572 = vmatpush3.bf16.msra.mxu1 %v643_v14 }
  0xf8   : > { %v312_v16 = vpop.f32.mrb[0].mxu0 }
  0xf9   : > { %v313_v17 = vadd.f32 %v521_v15, %v312_v16  ;;  %v555_v18 = vpop.f32.mrb[1].mxu0 }
  0xfa   : > { %v315_v19 = vpop.f32.mrb[2].mxu0 }
  0xfb   : > { %v318_v20 = vmax.f32 %v313_v17, 0.0  ;;  %v556_v21 = vpop.f32.mrb[3].mxu0 }
  0xfd   : > { %v320_v22 = vpack.c.bf16 %v318_v20, %v318_v20 }
  0xff   : > { %574 = vmatmul.mubr.bf16.vlgmr.msra.gmra.mrb[0].mxu1 %v320_v22 }
 0x1d2   : > { %v419_v24 = vpop.f32.mrb[0].mxu1 }
 0x1d3   : > { %v425_v25 = vadd.f32 %v419_v24, %v319_v23  ;;  %v575_v26 = vpop.f32.mrb[1].mxu1 }
 0x1d4   : > { %v422_v27 = vpop.f32.mrb[2].mxu1 }
 0x1d5   : > { %426 = vst.msk [vmem:[#allocation2] sm:$0xff] %vm248_vm1, %v425_v25  ;;  %v576_v28 = vpop.f32.mrb[3].mxu1 }
 0x1dc   : > { %v430_v29 = vld [vmem:[#allocation2] sm:$0xff] }
 0x1dd   : > { %431 = vst.msk [vmem:[%s227_s9] sm:$0xff] %vm248_vm1, %v430_v29 }
 0x1de   : > { %657 = shalt.err (!%p654_p5)
}
 0x1df   : > { %s658_s24 = scalar_lea.hbm %s861_s13, 128  ;;  %s662_s29 = scalar_lea.hbm %s914_s5, 256 }
 0x1e0   : > { %p659_p6 = scmp.ne.s32.totalorder %s861_s13, %s658_s24  ;;  %p663_p10 = scmp.lt.u32.totalorder %s861_s13, %s914_s5 }
 0x1e1   : > { %p664_p11 = scmp.lt.u32.totalorder %s662_s29, %s658_s24  ;;  %p666_p13 = scmp.lt.u32.totalorder %s658_s24, %s861_s13 }
 0x1e2   : > { %p660_p7 = pnand %p659_p6, %p797_p4 }
 0x1e3   : > { %p665_p12 = por %p664_p11, %p663_p10 }
 0x1e4   : > { %p661_p9 = pneg %p660_p7 }
 0x1e5   : > { %p667_p0 = por %p666_p13, %p665_p12 }
 0x1e7   : > { %p668_p1 = pnand %p667_p0, %p661_p9 }
 0x1e9   : > { %671 = shalt.err (!%p668_p1)
}
 0x1ea   : > { %577 = dma.vmem_to_hbm [thread:$0]  (%p797_p4), %s863_s10, 128, %s861_s13, %s433_s14  }
 0x1eb PF: > { %p583_p2 = scmp.ge.s32.totalorder %s722_s23, 2  ;;  %s458_s9 = sand.u32 1, %s702_s18  }
 0x1ec   : > { %s459_s11 = scalar_lea.sflag [#allocation5], %s458_s9 }
 0x1ed   : > { %p580_p3 = pnand %p583_p2, %p804_p8 }
 0x1ef   : > { %697 = dma.done.wait (!%p580_p3), %s459_s11, 128  }
 0x1f0   : > { %699 = vsyncadd (!%p580_p3), %s459_s11, 4294967168  ;;  %s18_s23 = sadd.s32 1, %s722_s23   ;;  %s917_s18 = smov %s706_s19 }
 0x1f1   : > { %p15_p5 = scmp.ge.s32.totalorder %s18_s23, 4   ;;  %s918_s19 = smov %s710_s20 }
 0x1f2   : > { %s919_s20 = smov %s810_s6  ;;  %s920_s21 = smov %s718_s22 }
 0x1f3   : > { %s921_s22 = smov %s923_s26  ;;  %17 = sbr.rel (!%p15_p5) target bundleno = 4 (0x4), region = 83 }
 0x1fa   :  { %464 = vsyncpa [#allocation5], 1 }
 0x1fb   :  { %466 = vsyncpa [#allocation5 + $0x1], 1 }

</bundles_post_ra>
